<compile_context>
chip_gen: v7x
topology: tpu7x:2x2x1
jax: 0.10.0
libtpu: 0.0.40
codegen_flags: <defaults>
</compile_context>

<pallas_src>
import numpy as np
import jax
import jax.numpy as jnp
from jax.experimental import pallas as pl
from jax.experimental.pallas import tpu as pltpu

_LANE = 128


# ----------------------------- Pallas kernel ------------------------------

def _pg_map_loss_kernel(f_score_ref, l_score_ref, l_mask_ref,
                        f_border_ref, l_border_ref,
                        f_direction_ref, l_direction_ref,
                        out_ref,
                        acc_inter, acc_u1, acc_u2, acc_border, acc_dir):
    """One grid step: accumulate per-lane partial sums for the dice / border /
    direction losses over a (B[, C], rows_tile, 128) spatial tile.

    Scratch accumulators of shape (rows_tile, 128) persist across the
    'arbitrary' tile axis; the five scalar (cross-lane) reductions plus the
    lane packing into out_ref happen exactly once per parallel slice, on its
    last tile.
    """
    t = pl.program_id(1)

    @pl.when(t == 0)
    def _init():
        acc_inter[...] = jnp.zeros_like(acc_inter)
        acc_u1[...] = jnp.zeros_like(acc_u1)
        acc_u2[...] = jnp.zeros_like(acc_u2)
        acc_border[...] = jnp.zeros_like(acc_border)
        acc_dir[...] = jnp.zeros_like(acc_dir)

    f = f_score_ref[...].astype(jnp.float32)     # (B, rt, 128)
    s = l_score_ref[...].astype(jnp.float32)     # tcl map
    m = l_mask_ref[...].astype(jnp.float32)      # training mask
    w = s * m                                    # hoisted; reused by every term

    acc_inter[...] += jnp.sum(f * w, axis=0)     # dice intersection
    acc_u1[...] += jnp.sum(f * m, axis=0)        # sum(pred * mask)
    acc_u2[...] += jnp.sum(w, axis=0)            # sum(gt * mask)

    def smooth_l1_partial(f3_ref, l3_ref, nch):
        fv = f3_ref[...].astype(jnp.float32)     # (B, nch,   rt, 128)
        lv = l3_ref[...].astype(jnp.float32)     # (B, nch+1, rt, 128)
        d = jnp.abs(lv[:, :nch] - fv)
        in_loss = jnp.where(d < 1.0, 0.5 * d * d, d - 0.5)
        per_pix = jnp.sum(in_loss, axis=1)       # channel reduce: leading-dim adds
        # norm channel * (l_score * l_mask) weight, reduce over batch -> (rt, 128)
        return jnp.sum(per_pix * lv[:, nch] * w, axis=0)

    acc_border[...] += smooth_l1_partial(f_border_ref, l_border_ref, 4)
    acc_dir[...] += smooth_l1_partial(f_direction_ref, l_direction_ref, 2)

    @pl.when(t == pl.num_programs(1) - 1)
    def _finalize():
        col = jax.lax.broadcasted_iota(jnp.int32, out_ref.shape, 2)
        out_ref[...] = (jnp.where(col == 0, jnp.sum(acc_inter[...]), 0.0) +
                        jnp.where(col == 1, jnp.sum(acc_u1[...]), 0.0) +
                        jnp.where(col == 2, jnp.sum(acc_u2[...]), 0.0) +
                        jnp.where(col == 3, jnp.sum(acc_border[...]), 0.0) +
                        jnp.where(col == 4, jnp.sum(acc_dir[...]), 0.0))


# ----------------------------- kernel wrapper ------------------------------

def map_losses(f_score, f_border, f_direction, tcl_maps, border_maps,
               direction_maps, training_masks, eps=1e-6):
    B = f_score.shape[0]
    H, W = f_score.shape[2], f_score.shape[3]
    hw = H * W
    L = _LANE

    maps2 = (f_score, tcl_maps, training_masks)
    maps3 = (f_border, border_maps, f_direction, direction_maps)

    # Bytes of all input blocks per spatial position (native dtypes; the kernel
    # casts to f32 in-register, so bf16 labels upstream halve this).
    bytes_per_elem = B * (sum(x.dtype.itemsize for x in maps2) +
                          sum(x.dtype.itemsize * x.shape[1] for x in maps3))

    rows_total = -(-hw // L)                     # 128-lane rows needed

    # VMEM budget: ~14 MiB per input block set, double-buffered by BlockSpec.
    per_buf_budget = 14 * 1024 * 1024
    rows_tile_max = max(8, (per_buf_budget // (bytes_per_elem * L)) // 8 * 8)

    # v7x: keep both TensorCores busy whenever there are >= 2 row-blocks.
    n_par = 2 if rows_total >= 16 else 1
    rows_per_par = -(-rows_total // n_par)
    n_tiles = -(-rows_per_par // rows_tile_max)
    rows_tile = ((-(-rows_per_par // n_tiles) + 7) // 8) * 8
    rows_padded = n_par * n_tiles * rows_tile
    hw_p = rows_padded * L                       # zero pad is exactly neutral

    def prep2(x):   # (B,1,H,W) -> (B, rows_padded, 128)
        x = x.reshape(B, hw)
        if hw_p != hw:
            x = jnp.pad(x, ((0, 0), (0, hw_p - hw)))
        return x.reshape(B, rows_padded, L)

    def prep3(x):   # (B,C,H,W) -> (B, C, rows_padded, 128)
        c = x.shape[1]
        x = x.reshape(B, c, hw)
        if hw_p != hw:
            x = jnp.pad(x, ((0, 0), (0, 0), (0, hw_p - hw)))
        return x.reshape(B, c, rows_padded, L)

    spec2 = pl.BlockSpec((B, rows_tile, L), lambda p, t: (0, p * n_tiles + t, 0))

    def spec3(c):
        return pl.BlockSpec((B, c, rows_tile, L),
                            lambda p, t: (0, 0, p * n_tiles + t, 0))

    in_block_bytes = bytes_per_elem * rows_tile * L
    scratch_bytes = 5 * rows_tile * L * 4
    vmem_limit = int(min(48 * 2**20,
                         max(32 * 2**20,
                             2 * in_block_bytes + scratch_bytes + 4 * 2**20)))

    out = pl.pallas_call(
        _pg_map_loss_kernel,
        out_shape=jax.ShapeDtypeStruct((n_par, 8, 128), jnp.float32),
        grid=(n_par, n_tiles),
        in_specs=[spec2, spec2, spec2,
                  spec3(4), spec3(5), spec3(2), spec3(3)],
        out_specs=pl.BlockSpec((1, 8, 128), lambda p, t: (p, 0, 0)),
        scratch_shapes=[pltpu.VMEM((rows_tile, L), jnp.float32)
                        for _ in range(5)],
        compiler_params=pltpu.CompilerParams(
            dimension_semantics=("parallel", "arbitrary"),
            vmem_limit_bytes=vmem_limit),
    )(prep2(f_score), prep2(tcl_maps), prep2(training_masks),
      prep3(f_border), prep3(border_maps), prep3(f_direction),
      prep3(direction_maps))

    sums = jnp.sum(out[:, 0, :], axis=0)         # combine per-core partials
    inter, u1, u2 = sums[0], sums[1], sums[2]
    num_border, num_direction = sums[3], sums[4]

    # eps / 1e-5 added exactly once, at finalize.
    score_loss = 1.0 - 2.0 * inter / (u1 + u2 + eps)
    border_loss = num_border / (4.0 * u2 + 1e-5)
    direction_loss = num_direction / (2.0 * u2 + 1e-5)
    return score_loss, border_loss, direction_loss


# ----------------------------- plain-JAX pieces ------------------------------

def ctc_nll(log_probs, targets, target_lengths, blank):
    """torch.nn.functional.ctc_loss(reduction='none') semantics: inputs are
    treated as log-probabilities (as in the reference module, which passes the
    masked logits directly) and run through the log-space forward DP.
    log_probs: (T, B, C); targets: (B, S); target_lengths: (B,)."""
    # TODO(synk): CTC forward DP (tiny variable-length log-space recurrence) has
    # no beneficial Pallas mapping here; kept in plain JAX (lax.scan).
    T, B, C = log_probs.shape
    S = targets.shape[1]
    NEG = jnp.float32(-1e30)

    ext = jnp.full((B, 2 * S + 1), blank, dtype=jnp.int32)
    ext = ext.at[:, 1::2].set(targets.astype(jnp.int32))
    lp_ext = jnp.take_along_axis(
        log_probs, jnp.broadcast_to(ext[None], (T, B, 2 * S + 1)), axis=2)

    ext_m2 = jnp.concatenate(
        [jnp.full((B, 2), blank, jnp.int32), ext[:, :-2]], axis=1)
    allow_skip = (ext != blank) & (ext != ext_m2)

    alpha0 = jnp.full((B, 2 * S + 1), NEG)
    alpha0 = alpha0.at[:, 0].set(lp_ext[0, :, 0])
    alpha0 = alpha0.at[:, 1].set(
        jnp.where(target_lengths > 0, lp_ext[0, :, 1], NEG))

    def lse3(a, b, c):
        mx = jnp.maximum(jnp.maximum(a, b), c)
        return mx + jnp.log(jnp.exp(a - mx) + jnp.exp(b - mx) + jnp.exp(c - mx))

    def step(alpha, lp_t):
        s1 = jnp.concatenate([jnp.full((B, 1), NEG), alpha[:, :-1]], axis=1)
        s2 = jnp.concatenate([jnp.full((B, 2), NEG), alpha[:, :-2]], axis=1)
        s2 = jnp.where(allow_skip, s2, NEG)
        return lse3(alpha, s1, s2) + lp_t, None

    alphaT, _ = jax.lax.scan(step, alpha0, lp_ext[1:])

    last = 2 * target_lengths.astype(jnp.int32)          # index of final blank
    l_last = jnp.take_along_axis(alphaT, last[:, None], axis=1)[:, 0]
    prev_idx = jnp.maximum(last - 1, 0)
    l_prev = jnp.take_along_axis(alphaT, prev_idx[:, None], axis=1)[:, 0]
    l_prev = jnp.where(target_lengths > 0, l_prev, NEG)
    mx = jnp.maximum(l_last, l_prev)
    return -(mx + jnp.log(jnp.exp(l_last - mx) + jnp.exp(l_prev - mx)))


def pre_process(label_list, pos_list, pos_mask, max_text_length,
                max_text_nums, pad_num, tcl_bs):
    # TODO(synk): the original pre_process/org_tcl_rois is host-side instance
    # selection & ROI re-batching (external helper, not part of the module);
    # this is a simplified deterministic equivalent producing the same shapes.
    label_np = np.asarray(label_list)   # (B, max_text_nums, max_text_length, 1)
    pos_np = np.asarray(pos_list)       # (B, max_text_nums, 64, 3)
    mask_np = np.asarray(pos_mask)      # (B, max_text_nums, 64, 1)
    B = label_np.shape[0]

    sel_pos, sel_mask, sel_label = [], [], []
    for i in range(B):
        for j in range(max_text_nums):
            if mask_np[i, j].any():
                sel_pos.append(pos_np[i, j])
                sel_mask.append(mask_np[i, j])
                sel_label.append(label_np[i, j])
    if not sel_pos:
        sel_pos, sel_mask, sel_label = [pos_np[0, 0]], [mask_np[0, 0]], [label_np[0, 0]]
    k = 0
    while len(sel_pos) < tcl_bs:
        sel_pos.append(sel_pos[k]); sel_mask.append(sel_mask[k])
        sel_label.append(sel_label[k]); k += 1
    sel_pos = np.stack(sel_pos[:tcl_bs]).astype(np.int32)
    sel_mask = np.stack(sel_mask[:tcl_bs]).astype(np.float32)
    sel_label = np.stack(sel_label[:tcl_bs]).astype(np.int32)

    label_t = []
    for i in range(tcl_bs):
        n = 0
        for j in range(max_text_length):
            if sel_label[i, j, 0] != pad_num:
                n += 1
            else:
                break
        label_t.append(n)

    return (jnp.asarray(sel_pos), jnp.asarray(sel_mask),
            jnp.asarray(sel_label.reshape(tcl_bs, max_text_length)),
            jnp.asarray(np.asarray(label_t, np.int32)))


# ----------------------------- PGLoss module ------------------------------

class PGLossPallas:
    def __init__(self, tcl_bs, max_text_length, max_text_nums, pad_num,
                 eps=1e-6, **kwargs):
        self.tcl_bs = tcl_bs
        self.max_text_length = max_text_length
        self.max_text_nums = max_text_nums
        self.pad_num = pad_num
        self.eps = eps

    def ctcloss(self, f_char, tcl_pos, tcl_mask, tcl_label, label_t):
        # Gather only the R = tcl_bs*64 needed points straight from the NCHW
        # map (no full-tensor transpose, no per-row Pallas grid).
        pos = tcl_pos.astype(jnp.int32)                  # (tcl_bs, 64, 3) = (b,y,x)
        b_idx, y_idx, x_idx = pos[..., 0], pos[..., 1], pos[..., 2]
        f_tcl_char = f_char[b_idx, :, y_idx, x_idx].astype(jnp.float32)  # (tcl_bs,64,C)

        mask = tcl_mask.astype(jnp.float32)              # (tcl_bs, 64, 1)
        fg = f_tcl_char[..., :self.pad_num] * mask + (1.0 - mask) * (-20.0)
        bg = f_tcl_char[..., self.pad_num:] * mask + (1.0 - mask) * 20.0
        f_tcl_char_mask = jnp.concatenate([fg, bg], axis=-1)

        log_probs = jnp.transpose(f_tcl_char_mask, (1, 0, 2))   # (T=64, tcl_bs, C)
        nll = ctc_nll(log_probs, tcl_label, label_t, blank=self.pad_num)
        return jnp.mean(nll)

    def __call__(self, predicts, labels):
        (images, tcl_maps, tcl_label_maps, border_maps, direction_maps,
         training_masks, label_list, pos_list, pos_mask) = labels
        pos_list, pos_mask, label_list, label_t = pre_process(
            label_list, pos_list, pos_mask, self.max_text_length,
            self.max_text_nums, self.pad_num, self.tcl_bs)

        f_score = predicts['f_score']
        f_border = predicts['f_border']
        f_direction = predicts['f_direction']
        f_char = predicts['f_char']

        score_loss, border_loss, direction_loss = map_losses(
            f_score, f_border, f_direction, tcl_maps, border_maps,
            direction_maps, training_masks, eps=self.eps)
        ctc_loss = self.ctcloss(f_char, pos_list, pos_mask, label_list, label_t)

        loss_all = score_loss + border_loss + direction_loss + 5.0 * ctc_loss
        return {'loss': loss_all, 'score_loss': score_loss,
                'border_loss': border_loss, 'direction_loss': direction_loss,
                'ctc_loss': ctc_loss}


# ----------------------------- demo / smoke test ------------------------------

if __name__ == "__main__":
    key = jax.random.PRNGKey(0)
    B, H, W = 2, 16, 16
    pad_num = 8
    C = pad_num + 1
    tcl_bs = 2
    max_text_nums = 4
    max_text_length = 8

    ks = jax.random.split(key, 12)
    # predictions
    f_score = jax.nn.sigmoid(jax.random.normal(ks[0], (B, 1, H, W), jnp.float32))
    f_border = jax.random.normal(ks[1], (B, 4, H, W), jnp.float32)
    f_direction = jax.random.normal(ks[2], (B, 2, H, W), jnp.float32)
    f_char = jax.random.normal(ks[3], (B, C, H, W), jnp.float32)

    # labels
    images = jax.random.normal(ks[4], (B, 3, H, W), jnp.float32)
    tcl_maps = (jax.random.uniform(ks[5], (B, 1, H, W)) > 0.5).astype(jnp.float32)
    tcl_label_maps = jax.random.uniform(ks[6], (B, 1, H, W))
    border_maps = jax.random.normal(ks[7], (B, 5, H, W), jnp.float32)
    direction_maps = jax.random.normal(ks[8], (B, 3, H, W), jnp.float32)
    training_masks = (jax.random.uniform(ks[9], (B, 1, H, W)) > 0.2).astype(jnp.float32)

    label_np = np.full((B, max_text_nums, max_text_length, 1), pad_num, np.int32)
    for i in range(B):
        for j in range(max_text_nums):
            n_char = 2 + (i + j) % (max_text_length - 2)
            label_np[i, j, :n_char, 0] = (np.arange(n_char) + i + j) % pad_num
    label_list = jnp.asarray(label_np)

    ys = jax.random.randint(ks[10], (B, max_text_nums, 64, 1), 0, H)
    xs = jax.random.randint(ks[11], (B, max_text_nums, 64, 1), 0, W)
    bidx = jnp.broadcast_to(jnp.arange(B, dtype=jnp.int32)[:, None, None, None],
                            (B, max_text_nums, 64, 1))
    pos_list = jnp.concatenate([bidx, ys.astype(jnp.int32), xs.astype(jnp.int32)],
                               axis=-1)                       # (batch, y, x)
    pm = np.zeros((B, max_text_nums, 64, 1), np.float32)
    pm[:, :, :40, :] = 1.0
    pos_mask = jnp.asarray(pm)

    predicts = {'f_score': f_score, 'f_border': f_border,
                'f_direction': f_direction, 'f_char': f_char}
    labels = (images, tcl_maps, tcl_label_maps, border_maps, direction_maps,
              training_masks, label_list, pos_list, pos_mask)

    loss_fn = PGLossPallas(tcl_bs=tcl_bs, max_text_length=max_text_length,
                           max_text_nums=max_text_nums, pad_num=pad_num)
    losses = loss_fn(predicts, labels)
    jax.block_until_ready(losses['loss'])
    print("KERNEL_OK")
</pallas_src>

<mosaic_0001>
module attributes {stable_mosaic.version = 11 : i64} {
  func.func @_pg_map_loss_kernel(%arg0: i32, %arg1: i32, %arg2: memref<2x8x128xf32, #tpu.memory_space<vmem>>, %arg3: memref<2x8x128xf32, #tpu.memory_space<vmem>>, %arg4: memref<2x8x128xf32, #tpu.memory_space<vmem>>, %arg5: memref<2x4x8x128xf32, #tpu.memory_space<vmem>>, %arg6: memref<2x5x8x128xf32, #tpu.memory_space<vmem>>, %arg7: memref<2x2x8x128xf32, #tpu.memory_space<vmem>>, %arg8: memref<2x3x8x128xf32, #tpu.memory_space<vmem>>, %arg9: memref<1x8x128xf32, #tpu.memory_space<vmem>>, %arg10: memref<8x128xf32, #tpu.memory_space<vmem>>, %arg11: memref<8x128xf32, #tpu.memory_space<vmem>>, %arg12: memref<8x128xf32, #tpu.memory_space<vmem>>, %arg13: memref<8x128xf32, #tpu.memory_space<vmem>>, %arg14: memref<8x128xf32, #tpu.memory_space<vmem>>) attributes {dimension_semantics = [#tpu.dimension_semantics<parallel>, #tpu.dimension_semantics<arbitrary>], iteration_bounds = array<i64: 1, 1>, scalar_prefetch = 0 : i64, scratch_operands = 5 : i64, tpu.core_type = #tpu.core_type<tc>, window_params = [{transform_indices = @transform_0, window_bounds = array<i64: 2, 8, 128>}, {transform_indices = @transform_1, window_bounds = array<i64: 2, 8, 128>}, {transform_indices = @transform_2, window_bounds = array<i64: 2, 8, 128>}, {transform_indices = @transform_3, window_bounds = array<i64: 2, 4, 8, 128>}, {transform_indices = @transform_4, window_bounds = array<i64: 2, 5, 8, 128>}, {transform_indices = @transform_5, window_bounds = array<i64: 2, 2, 8, 128>}, {transform_indices = @transform_6, window_bounds = array<i64: 2, 3, 8, 128>}, {transform_indices = @transform_7, window_bounds = array<i64: 1, 8, 128>}]} {
    %c0_i32 = arith.constant 0 : i32
    %0 = arith.cmpi eq, %arg1, %c0_i32 : i32
    %1 = arith.extui %0 : i1 to i32
    %c0_i32_0 = arith.constant 0 : i32
    %2 = arith.cmpi ne, %1, %c0_i32_0 : i32
    scf.if %2 {
      %cst_59 = arith.constant 0.000000e+00 : f32
      %68 = vector.broadcast %cst_59 : f32 to vector<8x128xf32>
      %c0_60 = arith.constant 0 : index
      %c0_61 = arith.constant 0 : index
      %69 = vector.load %arg10[%c0_60, %c0_61] : memref<8x128xf32, #tpu.memory_space<vmem>>, vector<8x128xf32>
      tpu.vector_store %arg10[%c0_60, %c0_61], %68 {strides = array<i32>} : memref<8x128xf32, #tpu.memory_space<vmem>>, vector<8x128xf32>,
      %cst_62 = arith.constant 0.000000e+00 : f32
      %70 = vector.broadcast %cst_62 : f32 to vector<8x128xf32>
      %c0_63 = arith.constant 0 : index
      %c0_64 = arith.constant 0 : index
      %71 = vector.load %arg11[%c0_63, %c0_64] : memref<8x128xf32, #tpu.memory_space<vmem>>, vector<8x128xf32>
      tpu.vector_store %arg11[%c0_63, %c0_64], %70 {strides = array<i32>} : memref<8x128xf32, #tpu.memory_space<vmem>>, vector<8x128xf32>,
      %cst_65 = arith.constant 0.000000e+00 : f32
      %72 = vector.broadcast %cst_65 : f32 to vector<8x128xf32>
      %c0_66 = arith.constant 0 : index
      %c0_67 = arith.constant 0 : index
      %73 = vector.load %arg12[%c0_66, %c0_67] : memref<8x128xf32, #tpu.memory_space<vmem>>, vector<8x128xf32>
      tpu.vector_store %arg12[%c0_66, %c0_67], %72 {strides = array<i32>} : memref<8x128xf32, #tpu.memory_space<vmem>>, vector<8x128xf32>,
      %cst_68 = arith.constant 0.000000e+00 : f32
      %74 = vector.broadcast %cst_68 : f32 to vector<8x128xf32>
      %c0_69 = arith.constant 0 : index
      %c0_70 = arith.constant 0 : index
      %75 = vector.load %arg13[%c0_69, %c0_70] : memref<8x128xf32, #tpu.memory_space<vmem>>, vector<8x128xf32>
      tpu.vector_store %arg13[%c0_69, %c0_70], %74 {strides = array<i32>} : memref<8x128xf32, #tpu.memory_space<vmem>>, vector<8x128xf32>,
      %cst_71 = arith.constant 0.000000e+00 : f32
      %76 = vector.broadcast %cst_71 : f32 to vector<8x128xf32>
      %c0_72 = arith.constant 0 : index
      %c0_73 = arith.constant 0 : index
      %77 = vector.load %arg14[%c0_72, %c0_73] : memref<8x128xf32, #tpu.memory_space<vmem>>, vector<8x128xf32>
      tpu.vector_store %arg14[%c0_72, %c0_73], %76 {strides = array<i32>} : memref<8x128xf32, #tpu.memory_space<vmem>>, vector<8x128xf32>,
    } else {
    }
    %c0 = arith.constant 0 : index
    %c0_1 = arith.constant 0 : index
    %c0_2 = arith.constant 0 : index
    %3 = vector.load %arg2[%c0, %c0_1, %c0_2] : memref<2x8x128xf32, #tpu.memory_space<vmem>>, vector<2x8x128xf32>
    %c0_3 = arith.constant 0 : index
    %c0_4 = arith.constant 0 : index
    %c0_5 = arith.constant 0 : index
    %4 = vector.load %arg3[%c0_3, %c0_4, %c0_5] : memref<2x8x128xf32, #tpu.memory_space<vmem>>, vector<2x8x128xf32>
    %c0_6 = arith.constant 0 : index
    %c0_7 = arith.constant 0 : index
    %c0_8 = arith.constant 0 : index
    %5 = vector.load %arg4[%c0_6, %c0_7, %c0_8] : memref<2x8x128xf32, #tpu.memory_space<vmem>>, vector<2x8x128xf32>
    %6 = arith.mulf %4, %5 : vector<2x8x128xf32>
    %c0_9 = arith.constant 0 : index
    %c0_10 = arith.constant 0 : index
    %7 = vector.load %arg10[%c0_9, %c0_10] : memref<8x128xf32, #tpu.memory_space<vmem>>, vector<8x128xf32>
    %8 = arith.mulf %3, %6 : vector<2x8x128xf32>
    %cst = arith.constant dense<0.000000e+00> : vector<8x128xf32>
    %9 = vector.multi_reduction <add>, %8, %cst [0] : vector<2x8x128xf32> to vector<8x128xf32>
    %10 = arith.addf %7, %9 : vector<8x128xf32>
    %c0_11 = arith.constant 0 : index
    %c0_12 = arith.constant 0 : index
    %11 = vector.load %arg10[%c0_11, %c0_12] : memref<8x128xf32, #tpu.memory_space<vmem>>, vector<8x128xf32>
    tpu.vector_store %arg10[%c0_11, %c0_12], %10 {strides = array<i32>} : memref<8x128xf32, #tpu.memory_space<vmem>>, vector<8x128xf32>,
    %c0_13 = arith.constant 0 : index
    %c0_14 = arith.constant 0 : index
    %12 = vector.load %arg11[%c0_13, %c0_14] : memref<8x128xf32, #tpu.memory_space<vmem>>, vector<8x128xf32>
    %13 = arith.mulf %3, %5 : vector<2x8x128xf32>
    %cst_15 = arith.constant dense<0.000000e+00> : vector<8x128xf32>
    %14 = vector.multi_reduction <add>, %13, %cst_15 [0] : vector<2x8x128xf32> to vector<8x128xf32>
    %15 = arith.addf %12, %14 : vector<8x128xf32>
    %c0_16 = arith.constant 0 : index
    %c0_17 = arith.constant 0 : index
    %16 = vector.load %arg11[%c0_16, %c0_17] : memref<8x128xf32, #tpu.memory_space<vmem>>, vector<8x128xf32>
    tpu.vector_store %arg11[%c0_16, %c0_17], %15 {strides = array<i32>} : memref<8x128xf32, #tpu.memory_space<vmem>>, vector<8x128xf32>,
    %c0_18 = arith.constant 0 : index
    %c0_19 = arith.constant 0 : index
    %17 = vector.load %arg12[%c0_18, %c0_19] : memref<8x128xf32, #tpu.memory_space<vmem>>, vector<8x128xf32>
    %cst_20 = arith.constant dense<0.000000e+00> : vector<8x128xf32>
    %18 = vector.multi_reduction <add>, %6, %cst_20 [0] : vector<2x8x128xf32> to vector<8x128xf32>
    %19 = arith.addf %17, %18 : vector<8x128xf32>
    %c0_21 = arith.constant 0 : index
    %c0_22 = arith.constant 0 : index
    %20 = vector.load %arg12[%c0_21, %c0_22] : memref<8x128xf32, #tpu.memory_space<vmem>>, vector<8x128xf32>
    tpu.vector_store %arg12[%c0_21, %c0_22], %19 {strides = array<i32>} : memref<8x128xf32, #tpu.memory_space<vmem>>, vector<8x128xf32>,
    %c0_23 = arith.constant 0 : index
    %c0_24 = arith.constant 0 : index
    %21 = vector.load %arg13[%c0_23, %c0_24] : memref<8x128xf32, #tpu.memory_space<vmem>>, vector<8x128xf32>
    %c0_25 = arith.constant 0 : index
    %c0_26 = arith.constant 0 : index
    %c0_27 = arith.constant 0 : index
    %c0_28 = arith.constant 0 : index
    %22 = vector.load %arg5[%c0_25, %c0_26, %c0_27, %c0_28] : memref<2x4x8x128xf32, #tpu.memory_space<vmem>>, vector<2x4x8x128xf32>
    %c0_29 = arith.constant 0 : index
    %c0_30 = arith.constant 0 : index
    %c0_31 = arith.constant 0 : index
    %c0_32 = arith.constant 0 : index
    %23 = vector.load %arg6[%c0_29, %c0_30, %c0_31, %c0_32] : memref<2x5x8x128xf32, #tpu.memory_space<vmem>>, vector<2x5x8x128xf32>
    %24 = vector.extract_strided_slice %23 {offsets = [0, 0, 0, 0], sizes = [2, 4, 8, 128], strides = [1, 1, 1, 1]} : vector<2x5x8x128xf32> to vector<2x4x8x128xf32>
    %25 = arith.subf %24, %22 : vector<2x4x8x128xf32>
    %26 = math.absf %25 : vector<2x4x8x128xf32>
    %cst_33 = arith.constant 1.000000e+00 : f32
    %27 = vector.broadcast %cst_33 : f32 to vector<2x4x8x128xf32>
    %28 = arith.cmpf olt, %26, %27 : vector<2x4x8x128xf32>
    %cst_34 = arith.constant 5.000000e-01 : f32
    %29 = vector.broadcast %cst_34 : f32 to vector<2x4x8x128xf32>
    %30 = arith.mulf %29, %26 : vector<2x4x8x128xf32>
    %31 = arith.mulf %30, %26 : vector<2x4x8x128xf32>
    %cst_35 = arith.constant 5.000000e-01 : f32
    %32 = vector.broadcast %cst_35 : f32 to vector<2x4x8x128xf32>
    %33 = arith.subf %26, %32 : vector<2x4x8x128xf32>
    %34 = arith.select %28, %31, %33 : vector<2x4x8x128xi1>, vector<2x4x8x128xf32>
    %cst_36 = arith.constant dense<0.000000e+00> : vector<2x8x128xf32>
    %35 = vector.multi_reduction <add>, %34, %cst_36 [1] : vector<2x4x8x128xf32> to vector<2x8x128xf32>
    %36 = vector.extract_strided_slice %23 {offsets = [0, 4, 0, 0], sizes = [2, 1, 8, 128], strides = [1, 1, 1, 1]} : vector<2x5x8x128xf32> to vector<2x1x8x128xf32>
    %37 = vector.shape_cast %36 : vector<2x1x8x128xf32> to vector<2x8x128xf32>
    %38 = arith.mulf %35, %37 : vector<2x8x128xf32>
    %39 = arith.mulf %38, %6 : vector<2x8x128xf32>
    %cst_37 = arith.constant dense<0.000000e+00> : vector<8x128xf32>
    %40 = vector.multi_reduction <add>, %39, %cst_37 [0] : vector<2x8x128xf32> to vector<8x128xf32>
    %41 = arith.addf %21, %40 : vector<8x128xf32>
    %c0_38 = arith.constant 0 : index
    %c0_39 = arith.constant 0 : index
    %42 = vector.load %arg13[%c0_38, %c0_39] : memref<8x128xf32, #tpu.memory_space<vmem>>, vector<8x128xf32>
    tpu.vector_store %arg13[%c0_38, %c0_39], %41 {strides = array<i32>} : memref<8x128xf32, #tpu.memory_space<vmem>>, vector<8x128xf32>,
    %c0_40 = arith.constant 0 : index
    %c0_41 = arith.constant 0 : index
    %43 = vector.load %arg14[%c0_40, %c0_41] : memref<8x128xf32, #tpu.memory_space<vmem>>, vector<8x128xf32>
    %c0_42 = arith.constant 0 : index
    %c0_43 = arith.constant 0 : index
    %c0_44 = arith.constant 0 : index
    %c0_45 = arith.constant 0 : index
    %44 = vector.load %arg7[%c0_42, %c0_43, %c0_44, %c0_45] : memref<2x2x8x128xf32, #tpu.memory_space<vmem>>, vector<2x2x8x128xf32>
    %c0_46 = arith.constant 0 : index
    %c0_47 = arith.constant 0 : index
    %c0_48 = arith.constant 0 : index
    %c0_49 = arith.constant 0 : index
    %45 = vector.load %arg8[%c0_46, %c0_47, %c0_48, %c0_49] : memref<2x3x8x128xf32, #tpu.memory_space<vmem>>, vector<2x3x8x128xf32>
    %46 = vector.extract_strided_slice %45 {offsets = [0, 0, 0, 0], sizes = [2, 2, 8, 128], strides = [1, 1, 1, 1]} : vector<2x3x8x128xf32> to vector<2x2x8x128xf32>
    %47 = arith.subf %46, %44 : vector<2x2x8x128xf32>
    %48 = math.absf %47 : vector<2x2x8x128xf32>
    %cst_50 = arith.constant 1.000000e+00 : f32
    %49 = vector.broadcast %cst_50 : f32 to vector<2x2x8x128xf32>
    %50 = arith.cmpf olt, %48, %49 : vector<2x2x8x128xf32>
    %cst_51 = arith.constant 5.000000e-01 : f32
    %51 = vector.broadcast %cst_51 : f32 to vector<2x2x8x128xf32>
    %52 = arith.mulf %51, %48 : vector<2x2x8x128xf32>
    %53 = arith.mulf %52, %48 : vector<2x2x8x128xf32>
    %cst_52 = arith.constant 5.000000e-01 : f32
    %54 = vector.broadcast %cst_52 : f32 to vector<2x2x8x128xf32>
    %55 = arith.subf %48, %54 : vector<2x2x8x128xf32>
    %56 = arith.select %50, %53, %55 : vector<2x2x8x128xi1>, vector<2x2x8x128xf32>
    %cst_53 = arith.constant dense<0.000000e+00> : vector<2x8x128xf32>
    %57 = vector.multi_reduction <add>, %56, %cst_53 [1] : vector<2x2x8x128xf32> to vector<2x8x128xf32>
    %58 = vector.extract_strided_slice %45 {offsets = [0, 2, 0, 0], sizes = [2, 1, 8, 128], strides = [1, 1, 1, 1]} : vector<2x3x8x128xf32> to vector<2x1x8x128xf32>
    %59 = vector.shape_cast %58 : vector<2x1x8x128xf32> to vector<2x8x128xf32>
    %60 = arith.mulf %57, %59 : vector<2x8x128xf32>
    %61 = arith.mulf %60, %6 : vector<2x8x128xf32>
    %cst_54 = arith.constant dense<0.000000e+00> : vector<8x128xf32>
    %62 = vector.multi_reduction <add>, %61, %cst_54 [0] : vector<2x8x128xf32> to vector<8x128xf32>
    %63 = arith.addf %43, %62 : vector<8x128xf32>
    %c0_55 = arith.constant 0 : index
    %c0_56 = arith.constant 0 : index
    %64 = vector.load %arg14[%c0_55, %c0_56] : memref<8x128xf32, #tpu.memory_space<vmem>>, vector<8x128xf32>
    tpu.vector_store %arg14[%c0_55, %c0_56], %63 {strides = array<i32>} : memref<8x128xf32, #tpu.memory_space<vmem>>, vector<8x128xf32>,
    %c0_i32_57 = arith.constant 0 : i32
    %65 = arith.cmpi eq, %arg1, %c0_i32_57 : i32
    %66 = arith.extui %65 : i1 to i32
    %c0_i32_58 = arith.constant 0 : i32
    %67 = arith.cmpi ne, %66, %c0_i32_58 : i32
    scf.if %67 {
      %68 = tpu.iota {dimensions = array<i32: 2>} : vector<1x8x128xi32>
      %c0_i32_59 = arith.constant 0 : i32
      %69 = vector.broadcast %c0_i32_59 : i32 to vector<1x8x128xi32>
      %70 = arith.cmpi eq, %68, %69 : vector<1x8x128xi32>
      %c0_60 = arith.constant 0 : index
      %c0_61 = arith.constant 0 : index
      %71 = vector.load %arg10[%c0_60, %c0_61] : memref<8x128xf32, #tpu.memory_space<vmem>>, vector<8x128xf32>
      %72 = vector.shape_cast %71 : vector<8x128xf32> to vector<1x8x128xf32>
      %cst_62 = arith.constant dense<0.000000e+00> : vector<1xf32>
      %73 = vector.multi_reduction <add>, %72, %cst_62 [1, 2] : vector<1x8x128xf32> to vector<1xf32>
      %74 = vector.shape_cast %73 : vector<1xf32> to vector<1x1x1xf32>
      %75 = vector.extract %74[0, 0, 0] : f32 from vector<1x1x1xf32>
      %cst_63 = arith.constant 0.000000e+00 : f32
      %76 = vector.broadcast %75 : f32 to vector<1x8x128xf32>
      %77 = vector.broadcast %cst_63 : f32 to vector<1x8x128xf32>
      %78 = arith.select %70, %76, %77 : vector<1x8x128xi1>, vector<1x8x128xf32>
      %c1_i32 = arith.constant 1 : i32
      %79 = vector.broadcast %c1_i32 : i32 to vector<1x8x128xi32>
      %80 = arith.cmpi eq, %68, %79 : vector<1x8x128xi32>
      %c0_64 = arith.constant 0 : index
      %c0_65 = arith.constant 0 : index
      %81 = vector.load %arg11[%c0_64, %c0_65] : memref<8x128xf32, #tpu.memory_space<vmem>>, vector<8x128xf32>
      %82 = vector.shape_cast %81 : vector<8x128xf32> to vector<1x8x128xf32>
      %cst_66 = arith.constant dense<0.000000e+00> : vector<1xf32>
      %83 = vector.multi_reduction <add>, %82, %cst_66 [1, 2] : vector<1x8x128xf32> to vector<1xf32>
      %84 = vector.shape_cast %83 : vector<1xf32> to vector<1x1x1xf32>
      %85 = vector.extract %84[0, 0, 0] : f32 from vector<1x1x1xf32>
      %cst_67 = arith.constant 0.000000e+00 : f32
      %86 = vector.broadcast %85 : f32 to vector<1x8x128xf32>
      %87 = vector.broadcast %cst_67 : f32 to vector<1x8x128xf32>
      %88 = arith.select %80, %86, %87 : vector<1x8x128xi1>, vector<1x8x128xf32>
      %89 = arith.addf %78, %88 : vector<1x8x128xf32>
      %c2_i32 = arith.constant 2 : i32
      %90 = vector.broadcast %c2_i32 : i32 to vector<1x8x128xi32>
      %91 = arith.cmpi eq, %68, %90 : vector<1x8x128xi32>
      %c0_68 = arith.constant 0 : index
      %c0_69 = arith.constant 0 : index
      %92 = vector.load %arg12[%c0_68, %c0_69] : memref<8x128xf32, #tpu.memory_space<vmem>>, vector<8x128xf32>
      %93 = vector.shape_cast %92 : vector<8x128xf32> to vector<1x8x128xf32>
      %cst_70 = arith.constant dense<0.000000e+00> : vector<1xf32>
      %94 = vector.multi_reduction <add>, %93, %cst_70 [1, 2] : vector<1x8x128xf32> to vector<1xf32>
      %95 = vector.shape_cast %94 : vector<1xf32> to vector<1x1x1xf32>
      %96 = vector.extract %95[0, 0, 0] : f32 from vector<1x1x1xf32>
      %cst_71 = arith.constant 0.000000e+00 : f32
      %97 = vector.broadcast %96 : f32 to vector<1x8x128xf32>
      %98 = vector.broadcast %cst_71 : f32 to vector<1x8x128xf32>
      %99 = arith.select %91, %97, %98 : vector<1x8x128xi1>, vector<1x8x128xf32>
      %100 = arith.addf %89, %99 : vector<1x8x128xf32>
      %c3_i32 = arith.constant 3 : i32
      %101 = vector.broadcast %c3_i32 : i32 to vector<1x8x128xi32>
      %102 = arith.cmpi eq, %68, %101 : vector<1x8x128xi32>
      %c0_72 = arith.constant 0 : index
      %c0_73 = arith.constant 0 : index
      %103 = vector.load %arg13[%c0_72, %c0_73] : memref<8x128xf32, #tpu.memory_space<vmem>>, vector<8x128xf32>
      %104 = vector.shape_cast %103 : vector<8x128xf32> to vector<1x8x128xf32>
      %cst_74 = arith.constant dense<0.000000e+00> : vector<1xf32>
      %105 = vector.multi_reduction <add>, %104, %cst_74 [1, 2] : vector<1x8x128xf32> to vector<1xf32>
      %106 = vector.shape_cast %105 : vector<1xf32> to vector<1x1x1xf32>
      %107 = vector.extract %106[0, 0, 0] : f32 from vector<1x1x1xf32>
      %cst_75 = arith.constant 0.000000e+00 : f32
      %108 = vector.broadcast %107 : f32 to vector<1x8x128xf32>
      %109 = vector.broadcast %cst_75 : f32 to vector<1x8x128xf32>
      %110 = arith.select %102, %108, %109 : vector<1x8x128xi1>, vector<1x8x128xf32>
      %111 = arith.addf %100, %110 : vector<1x8x128xf32>
      %c4_i32 = arith.constant 4 : i32
      %112 = vector.broadcast %c4_i32 : i32 to vector<1x8x128xi32>
      %113 = arith.cmpi eq, %68, %112 : vector<1x8x128xi32>
      %c0_76 = arith.constant 0 : index
      %c0_77 = arith.constant 0 : index
      %114 = vector.load %arg14[%c0_76, %c0_77] : memref<8x128xf32, #tpu.memory_space<vmem>>, vector<8x128xf32>
      %115 = vector.shape_cast %114 : vector<8x128xf32> to vector<1x8x128xf32>
      %cst_78 = arith.constant dense<0.000000e+00> : vector<1xf32>
      %116 = vector.multi_reduction <add>, %115, %cst_78 [1, 2] : vector<1x8x128xf32> to vector<1xf32>
      %117 = vector.shape_cast %116 : vector<1xf32> to vector<1x1x1xf32>
      %118 = vector.extract %117[0, 0, 0] : f32 from vector<1x1x1xf32>
      %cst_79 = arith.constant 0.000000e+00 : f32
      %119 = vector.broadcast %118 : f32 to vector<1x8x128xf32>
      %120 = vector.broadcast %cst_79 : f32 to vector<1x8x128xf32>
      %121 = arith.select %113, %119, %120 : vector<1x8x128xi1>, vector<1x8x128xf32>
      %122 = arith.addf %111, %121 : vector<1x8x128xf32>
      %c0_80 = arith.constant 0 : index
      %c0_81 = arith.constant 0 : index
      %c0_82 = arith.constant 0 : index
      %123 = vector.load %arg9[%c0_80, %c0_81, %c0_82] : memref<1x8x128xf32, #tpu.memory_space<vmem>>, vector<1x8x128xf32>
      tpu.vector_store %arg9[%c0_80, %c0_81, %c0_82], %122 {strides = array<i32>} : memref<1x8x128xf32, #tpu.memory_space<vmem>>, vector<1x8x128xf32>,
    } else {
    }
    return
  }
  func.func @transform_0(%arg0: i32, %arg1: i32) -> (i32, i32, i32) {
    %c1_i32 = arith.constant 1 : i32
    %0 = arith.muli %arg0, %c1_i32 : i32
    %1 = arith.addi %0, %arg1 : i32
    %c0_i32 = arith.constant 0 : i32
    %c0_i32_0 = arith.constant 0 : i32
    %c0_i32_1 = arith.constant 0 : i32
    return %c0_i32, %1, %c0_i32_0 : i32, i32, i32
  }
  func.func @transform_1(%arg0: i32, %arg1: i32) -> (i32, i32, i32) {
    %c1_i32 = arith.constant 1 : i32
    %0 = arith.muli %arg0, %c1_i32 : i32
    %1 = arith.addi %0, %arg1 : i32
    %c0_i32 = arith.constant 0 : i32
    %c0_i32_0 = arith.constant 0 : i32
    %c0_i32_1 = arith.constant 0 : i32
    return %c0_i32, %1, %c0_i32_0 : i32, i32, i32
  }
  func.func @transform_2(%arg0: i32, %arg1: i32) -> (i32, i32, i32) {
    %c1_i32 = arith.constant 1 : i32
    %0 = arith.muli %arg0, %c1_i32 : i32
    %1 = arith.addi %0, %arg1 : i32
    %c0_i32 = arith.constant 0 : i32
    %c0_i32_0 = arith.constant 0 : i32
    %c0_i32_1 = arith.constant 0 : i32
    return %c0_i32, %1, %c0_i32_0 : i32, i32, i32
  }
  func.func @transform_3(%arg0: i32, %arg1: i32) -> (i32, i32, i32, i32) {
    %c1_i32 = arith.constant 1 : i32
    %0 = arith.muli %arg0, %c1_i32 : i32
    %1 = arith.addi %0, %arg1 : i32
    %c0_i32 = arith.constant 0 : i32
    %c0_i32_0 = arith.constant 0 : i32
    %c0_i32_1 = arith.constant 0 : i32
    %c0_i32_2 = arith.constant 0 : i32
    return %c0_i32, %c0_i32_0, %1, %c0_i32_1 : i32, i32, i32, i32
  }
  func.func @transform_4(%arg0: i32, %arg1: i32) -> (i32, i32, i32, i32) {
    %c1_i32 = arith.constant 1 : i32
    %0 = arith.muli %arg0, %c1_i32 : i32
    %1 = arith.addi %0, %arg1 : i32
    %c0_i32 = arith.constant 0 : i32
    %c0_i32_0 = arith.constant 0 : i32
    %c0_i32_1 = arith.constant 0 : i32
    %c0_i32_2 = arith.constant 0 : i32
    return %c0_i32, %c0_i32_0, %1, %c0_i32_1 : i32, i32, i32, i32
  }
  func.func @transform_5(%arg0: i32, %arg1: i32) -> (i32, i32, i32, i32) {
    %c1_i32 = arith.constant 1 : i32
    %0 = arith.muli %arg0, %c1_i32 : i32
    %1 = arith.addi %0, %arg1 : i32
    %c0_i32 = arith.constant 0 : i32
    %c0_i32_0 = arith.constant 0 : i32
    %c0_i32_1 = arith.constant 0 : i32
    %c0_i32_2 = arith.constant 0 : i32
    return %c0_i32, %c0_i32_0, %1, %c0_i32_1 : i32, i32, i32, i32
  }
  func.func @transform_6(%arg0: i32, %arg1: i32) -> (i32, i32, i32, i32) {
    %c1_i32 = arith.constant 1 : i32
    %0 = arith.muli %arg0, %c1_i32 : i32
    %1 = arith.addi %0, %arg1 : i32
    %c0_i32 = arith.constant 0 : i32
    %c0_i32_0 = arith.constant 0 : i32
    %c0_i32_1 = arith.constant 0 : i32
    %c0_i32_2 = arith.constant 0 : i32
    return %c0_i32, %c0_i32_0, %1, %c0_i32_1 : i32, i32, i32, i32
  }
  func.func @transform_7(%arg0: i32, %arg1: i32) -> (i32, i32, i32) {
    %c0_i32 = arith.constant 0 : i32
    %c0_i32_0 = arith.constant 0 : i32
    %c0_i32_1 = arith.constant 0 : i32
    return %arg0, %c0_i32, %c0_i32_0 : i32, i32, i32
  }
}

</mosaic_0001>

<bundles_post_ra>
// kernel: tpu_custom_call.1
= control target key start
LH: loop header
LB: loop body
LE: loop exit
PB: predicated region body
PF: predicated region fallthrough
CT: control target
= control target key end

     0   :  { %12 = vsyncpa [#allocation8], 0  ;;  %s840_s0 = inlined_call_operand.hbm [shape: f32[2,8,128], index: 0, kind: input, shape index: {}]   ;;  %s841_s1 = inlined_call_operand.hbm [shape: f32[2,8,128], index: 1, kind: input, shape index: {}]   ;;  %s842_s2 = inlined_call_operand.hbm [shape: f32[2,8,128], index: 2, kind: input, shape index: {}]   ;;  %s843_s3 = inlined_call_operand.hbm [shape: f32[2,4,8,128], index: 3, kind: input, shape index: {}]   ;;  %s844_s4 = inlined_call_operand.hbm [shape: f32[2,5,8,128], index: 4, kind: input, shape index: {}]   ;;  %s845_s5 = inlined_call_operand.hbm [shape: f32[2,2,8,128], index: 5, kind: input, shape index: {}]   ;;  %s846_s6 = inlined_call_operand.hbm [shape: f32[2,3,8,128], index: 6, kind: input, shape index: {}]   ;;  %s847_s7 = inlined_call_operand.hbm [shape: f32[1,8,128], index: 7, kind: output, shape index: {}]  }
   0x1   :  { %13 = vsyncpa [#allocation11], 0 }
   0x2   :  { %14 = vsyncpa [#allocation14], 0 }
   0x3   :  { %15 = vsyncpa [#allocation17], 0 }
   0x4   :  { %16 = vsyncpa [#allocation9], 0  ;;  %s630_s24 = smov [#allocation10]   ;;  %s631_s26 = smov [#allocation13]  }
   0x5   :  { %s40_s25 = sshll.u32 %s630_s24, 4  ;;  %s70_s27 = sshll.u32 %s631_s26, 4  ;;  %s41_s25 = int_to_ptr.vmem [resolvable:$true] %s40_s25  ;;  %s680_s27 = int_to_ptr.vmem [resolvable:$true] %s70_s27 }
   0x6   :  { %s444_s30 = scalar_lea.hbm %s841_s1, 256 }
   0x7   :  { %p445_p0 = scmp.ne.s32.totalorder %s841_s1, %s444_s30  ;;  %p448_p1 = scmp.lt.u32.totalorder %s444_s30, %s841_s1 }
   0x9   :  { %p450_p2 = pnand %p448_p1, %p445_p0 }
   0xb   :  { %453 = shalt.err (!%p450_p2)
}
   0xc   :  { %s454_s12 = scalar_lea.vmem %s41_s25, 256  ;;  %p459_p4 = scmp.lt.s32.totalorder %s41_s25, %s41_s25 }
   0xd   :  { %p455_p3 = scmp.ne.s32.totalorder %s41_s25, %s454_s12  ;;  %p460_p5 = scmp.lt.s32.totalorder %s454_s12, %s454_s12 }
   0xf   :  { %p461_p6 = por %p460_p5, %p459_p4 }
  0x11   :  { %p462_p7 = pnand %p461_p6, %p455_p3 }
  0x13   :  { %465 = shalt.err (!%p462_p7)
}
  0x14   :  { %s632_s13 = smov 128   ;;  %s633_s14 = smov 8  }
  0x15   :  { %46 = dma.hbm_to_vmem [thread:$0]  %s841_s1, 256, %s41_s25, [#allocation11], %s632_s13, %s632_s13, %s633_s14  }
  0x16   :  { %s466_s19 = scalar_lea.hbm %s843_s3, 1024 }
  0x17   :  { %p467_p8 = scmp.ne.s32.totalorder %s843_s3, %s466_s19  ;;  %p470_p9 = scmp.lt.u32.totalorder %s466_s19, %s843_s3 }
  0x19   :  { %p472_p10 = pnand %p470_p9, %p467_p8 }
  0x1b   :  { %475 = shalt.err (!%p472_p10)
}
  0x1c   :  { %s476_s24 = scalar_lea.vmem %s680_s27, 1024  ;;  %p481_p12 = scmp.lt.s32.totalorder %s680_s27, %s680_s27 }
  0x1d   :  { %p477_p11 = scmp.ne.s32.totalorder %s680_s27, %s476_s24  ;;  %p482_p13 = scmp.lt.s32.totalorder %s476_s24, %s476_s24 }
  0x1f   :  { %p483_p0 = por %p482_p13, %p481_p12 }
  0x21   :  { %p484_p1 = pnand %p483_p0, %p477_p11 }
  0x23   :  { %487 = shalt.err (!%p484_p1)
}
  0x24   :  { %76 = dma.hbm_to_vmem [thread:$0]  %s843_s3, 1024, %s680_s27, [#allocation14], %s632_s13, %s632_s13, %s633_s14  }
  0x25   :  { %s634_s26 = smov [#allocation16]   ;;  %s635_s29 = smov [#allocation7]  }
  0x26   :  { %s100_s28 = sshll.u32 %s634_s26, 4  ;;  %s25_s30 = sshll.u32 %s635_s29, 4  ;;  %s101_s28 = int_to_ptr.vmem [resolvable:$true] %s100_s28  ;;  %s717_s30 = int_to_ptr.vmem [resolvable:$true] %s25_s30 }
  0x27   :  { %s488_s10 = scalar_lea.hbm %s845_s5, 512 }
  0x28   :  { %p489_p2 = scmp.ne.s32.totalorder %s845_s5, %s488_s10  ;;  %p492_p3 = scmp.lt.u32.totalorder %s488_s10, %s845_s5 }
  0x2a   :  { %p494_p4 = pnand %p492_p3, %p489_p2 }
  0x2c   :  { %497 = shalt.err (!%p494_p4)
}
  0x2d   :  { %s498_s3 = scalar_lea.vmem %s101_s28, 512  ;;  %p503_p6 = scmp.lt.s32.totalorder %s101_s28, %s101_s28 }
  0x2e   :  { %p499_p5 = scmp.ne.s32.totalorder %s101_s28, %s498_s3  ;;  %p504_p7 = scmp.lt.s32.totalorder %s498_s3, %s498_s3 }
  0x30   :  { %p505_p8 = por %p504_p7, %p503_p6 }
  0x32   :  { %p506_p9 = pnand %p505_p8, %p499_p5 }
  0x34   :  { %509 = shalt.err (!%p506_p9)
}
  0x35   :  { %106 = dma.hbm_to_vmem [thread:$0]  %s845_s5, 512, %s101_s28, [#allocation17], %s632_s13, %s632_s13, %s633_s14  }
  0x36   :  { %s510_s20 = scalar_lea.hbm %s840_s0, 256 }
  0x37   :  { %p511_p10 = scmp.ne.s32.totalorder %s840_s0, %s510_s20  ;;  %p514_p11 = scmp.lt.u32.totalorder %s510_s20, %s840_s0 }
  0x39   :  { %p516_p12 = pnand %p514_p11, %p511_p10 }
  0x3b   :  { %519 = shalt.err (!%p516_p12)
}
  0x3c   :  { %s520_s1 = scalar_lea.vmem %s717_s30, 256  ;;  %p525_p0 = scmp.lt.s32.totalorder %s717_s30, %s717_s30 }
  0x3d   :  { %p521_p13 = scmp.ne.s32.totalorder %s717_s30, %s520_s1  ;;  %p526_p1 = scmp.lt.s32.totalorder %s520_s1, %s520_s1 }
  0x3f   :  { %p527_p2 = por %p526_p1, %p525_p0 }
  0x41   :  { %p528_p3 = pnand %p527_p2, %p521_p13 }
  0x43   :  { %531 = shalt.err (!%p528_p3)
}
  0x44   :  { %31 = dma.hbm_to_vmem [thread:$0]  %s840_s0, 256, %s717_s30, [#allocation8], %s632_s13, %s632_s13, %s633_s14  }
  0x45   :  { %s636_s26 = smov [#allocation12]   ;;  %s637_s29 = smov [#allocation15]  }
  0x46   :  { %s55_s28 = sshll.u32 %s636_s26, 4  ;;  %s85_s8 = sshll.u32 %s637_s29, 4  ;;  %s56_s28 = int_to_ptr.vmem [resolvable:$true] %s55_s28  ;;  %s754_s8 = int_to_ptr.vmem [resolvable:$true] %s85_s8 }
  0x47   :  { %s532_s11 = scalar_lea.hbm %s842_s2, 256 }
  0x48   :  { %p533_p4 = scmp.ne.s32.totalorder %s842_s2, %s532_s11  ;;  %p536_p5 = scmp.lt.u32.totalorder %s532_s11, %s842_s2 }
  0x4a   :  { %p538_p6 = pnand %p536_p5, %p533_p4 }
  0x4c   :  { %541 = shalt.err (!%p538_p6)
}
  0x4d   :  { %s542_s0 = scalar_lea.vmem %s56_s28, 256  ;;  %p547_p8 = scmp.lt.s32.totalorder %s56_s28, %s56_s28 }
  0x4e   :  { %p543_p7 = scmp.ne.s32.totalorder %s56_s28, %s542_s0  ;;  %p548_p9 = scmp.lt.s32.totalorder %s542_s0, %s542_s0 }
  0x50   :  { %p549_p10 = por %p548_p9, %p547_p8 }
  0x52   :  { %p550_p11 = pnand %p549_p10, %p543_p7 }
  0x54   :  { %553 = shalt.err (!%p550_p11)
}
  0x55   :  { %61 = dma.hbm_to_vmem [thread:$0]  %s842_s2, 256, %s56_s28, [#allocation11], %s632_s13, %s632_s13, %s633_s14  }
  0x56   :  { %s554_s19 = scalar_lea.hbm %s844_s4, 1280 }
  0x57   :  { %p555_p12 = scmp.ne.s32.totalorder %s844_s4, %s554_s19  ;;  %p558_p13 = scmp.lt.u32.totalorder %s554_s19, %s844_s4 }
  0x59   :  { %p560_p0 = pnand %p558_p13, %p555_p12 }
  0x5b   :  { %563 = shalt.err (!%p560_p0)
}
  0x5c   :  { %s564_s24 = scalar_lea.vmem %s754_s8, 1280  ;;  %p569_p2 = scmp.lt.s32.totalorder %s754_s8, %s754_s8 }
  0x5d   :  { %p565_p1 = scmp.ne.s32.totalorder %s754_s8, %s564_s24  ;;  %p570_p3 = scmp.lt.s32.totalorder %s564_s24, %s564_s24 }
  0x5f   :  { %p571_p4 = por %p570_p3, %p569_p2 }
  0x61   :  { %p572_p5 = pnand %p571_p4, %p565_p1 }
  0x63   :  { %575 = shalt.err (!%p572_p5)
}
  0x64   :  { %91 = dma.hbm_to_vmem [thread:$0]  %s844_s4, 1280, %s754_s8, [#allocation14], %s632_s13, %s632_s13, %s633_s14  }
  0x65   :  { %s638_s5 = smov [#allocation18]   ;;  %s576_s29 = scalar_lea.hbm %s846_s6, 768 }
  0x66   :  { %s115_s25 = sshll.u32 %s638_s5, 4  ;;  %p577_p6 = scmp.ne.s32.totalorder %s846_s6, %s576_s29  ;;  %s116_s25 = int_to_ptr.vmem [resolvable:$true] %s115_s25 }
  0x67   :  { %p580_p7 = scmp.lt.u32.totalorder %s576_s29, %s846_s6 }
  0x69   :  { %p582_p8 = pnand %p580_p7, %p577_p6 }
  0x6b   :  { %585 = shalt.err (!%p582_p8)
}
  0x6c   :  { %s586_s15 = scalar_lea.vmem %s116_s25, 768  ;;  %p591_p10 = scmp.lt.s32.totalorder %s116_s25, %s116_s25 }
  0x6d   :  { %p587_p9 = scmp.ne.s32.totalorder %s116_s25, %s586_s15  ;;  %p592_p11 = scmp.lt.s32.totalorder %s586_s15, %s586_s15 }
  0x6f   :  { %p593_p12 = por %p592_p11, %p591_p10 }
  0x71   :  { %p594_p13 = pnand %p593_p12, %p587_p9 }
  0x73   :  { %597 = shalt.err (!%p594_p13)
}
  0x74   :  { %121 = dma.hbm_to_vmem [thread:$0]  %s846_s6, 768, %s116_s25, [#allocation17], %s632_s13, %s632_s13, %s633_s14  }
  0x75   :  { %620 = dma.done.wait [#allocation8], 256  }
  0x76   :  { %621 = vsyncadd [#allocation8], 4294967040 }
  0x77   :  { %622 = dma.done.wait [#allocation11], 512  }
  0x78   :  { %623 = vsyncadd [#allocation11], 4294966784 }
  0x79   :  { %624 = dma.done.wait [#allocation14], 2304  }
  0x7a   :  { %625 = vsyncadd [#allocation14], 4294964992 }
  0x7b   :  { %626 = dma.done.wait [#allocation17], 1280  }
  0x7c   :  { %627 = vsyncadd [#allocation17], 4294966016  ;;  %v159_v0 = vld [vmem:[#allocation7] sm:$0xff]  ;;  %v160_v1 = vld [vmem:[#allocation7 + $0x8] sm:$0xff]  ;;  %s639_s0 = smov [#allocation19]  }
  0x7d   :  { %v161_v2 = vld [vmem:[#allocation10] sm:$0xff]  ;;  %v162_v3 = vld [vmem:[#allocation10 + $0x8] sm:$0xff]  ;;  %v163_v4 = vld [vmem:[#allocation12] sm:$0xff]  ;;  %s400_s30 = sshll.u32 %s639_s0, 4  ;;  %s401_s30 = int_to_ptr.vmem [resolvable:$true] %s400_s30 }
  0x7e   :  { %v164_v5 = vld [vmem:[#allocation12 + $0x8] sm:$0xff]  ;;  %v806_v6 = vmul.f32 %v163_v4, %v161_v2  ;;  %v272_v8 = vld [vmem:[#allocation16] sm:$0xff]  ;;  %v274_v10 = vld [vmem:[#allocation16 + $0x10] sm:$0xff]  ;;  %v174_v11 = vmul.f32 %v163_v4, %v159_v0  ;;  %s598_s27 = scalar_lea.vmem %s401_s30, 128  ;;  %p603_p1 = scmp.lt.s32.totalorder %s401_s30, %s401_s30 }
  0x7f   :  { %v808_v7 = vmul.f32 %v164_v5, %v162_v3  ;;  %v273_v9 = vld [vmem:[#allocation16 + $0x8] sm:$0xff]  ;;  %v275_v12 = vld [vmem:[#allocation16 + $0x18] sm:$0xff]  ;;  %v276_v13 = vld [vmem:[#allocation18] sm:$0xff]  ;;  %v175_v17 = vmul.f32 %v164_v5, %v160_v1  ;;  %p599_p0 = scmp.ne.s32.totalorder %s401_s30, %s598_s27  ;;  %p604_p2 = scmp.lt.s32.totalorder %s598_s27, %s598_s27 }
  0x80   :  { %v277_v14 = vld [vmem:[#allocation18 + $0x8] sm:$0xff]  ;;  %v168_v15 = vmul.f32 %v806_v6, %v159_v0  ;;  %v279_v19 = vld [vmem:[#allocation18 + $0x18] sm:$0xff]  ;;  %v280_v20 = vld [vmem:[#allocation18 + $0x20] sm:$0xff]  ;;  %v282_v21 = vsub.f32 %v276_v13, %v272_v8 }
  0x81   :  { %v169_v16 = vmul.f32 %v808_v7, %v160_v1  ;;  %v180_v18 = vadd.f32 %v808_v7, %v806_v6  ;;  %v283_v22 = vsub.f32 %v277_v14, %v273_v9  ;;  %v284_v23 = vsub.f32 %v279_v19, %v274_v10  ;;  %v184_v31 = vld [vmem:[#allocation13] sm:$0xff]  ;;  %v185_v32 = vld [vmem:[#allocation13 + $0x8] sm:$0xff]  ;;  %v186_v33 = vld [vmem:[#allocation13 + $0x10] sm:$0xff]  ;;  %p605_p3 = por %p604_p2, %p603_p1 }
  0x82   :  { %v285_v24 = vsub.f32 %v280_v20, %v275_v12  ;;  %v286_v26 = vand.u32 2147483647, %v282_v21  ;;  %v176_v29 = vadd.f32 %v175_v17, %v174_v11  ;;  %v187_v35 = vld [vmem:[#allocation13 + $0x18] sm:$0xff]  ;;  %v192_v36 = vld [vmem:[#allocation15] sm:$0xff]  ;;  %v193_v40 = vld [vmem:[#allocation15 + $0x8] sm:$0xff] }
  0x83   :  { %v170_v25 = vadd.f32 %v169_v16, %v168_v15  ;;  %353 = vadd.xlane.f32.xlu1 %v180_v18  ;;  %v287_v27 = vand.u32 2147483647, %v283_v22  ;;  %v288_v28 = vand.u32 2147483647, %v284_v23  ;;  %v194_v41 = vld [vmem:[#allocation15 + $0x10] sm:$0xff]  ;;  %v188_v46 = vld [vmem:[#allocation13 + $0x20] sm:$0xff]  ;;  %v202_v60 = vsub.f32 %v192_v36, %v184_v31  ;;  %p606_p4 = pnand %p605_p3, %p599_p0 }
  0x84   :  { %v289_v30 = vand.u32 2147483647, %v285_v24  ;;  %vm290_vm0 = vcmp.lt.f32.partialorder %v286_v26, 1.0  ;;  %v294_v34 = vmul.f32 0.5, %v286_v26  ;;  %v420_v43 = vadd.f32 -0.5, %v286_v26  ;;  %v189_v47 = vld [vmem:[#allocation13 + $0x28] sm:$0xff] }
  0x85   :  { %326 = vadd.xlane.f32.xlu0 %v170_v25  ;;  %vm291_vm1 = vcmp.lt.f32.partialorder %v287_v27, 1.0  ;;  %vm292_vm2 = vcmp.lt.f32.partialorder %v288_v28, 1.0  ;;  %v295_v37 = vmul.f32 0.5, %v287_v27  ;;  %v296_v38 = vmul.f32 0.5, %v288_v28  ;;  %v195_v48 = vld [vmem:[#allocation15 + $0x18] sm:$0xff]  ;;  %v190_v53 = vld [vmem:[#allocation13 + $0x30] sm:$0xff] }
  0x86   :  { %vm293_vm3 = vcmp.lt.f32.partialorder %v289_v30, 1.0  ;;  %v297_v39 = vmul.f32 0.5, %v289_v30  ;;  %v298_v42 = vmul.f32 %v294_v34, %v286_v26  ;;  %v421_v44 = vadd.f32 -0.5, %v287_v27  ;;  %v197_v54 = vld [vmem:[#allocation15 + $0x28] sm:$0xff]  ;;  %v198_v55 = vld [vmem:[#allocation15 + $0x30] sm:$0xff]  ;;  %v191_v57 = vld [vmem:[#allocation13 + $0x38] sm:$0xff] }
  0x87   :  { %v422_v45 = vadd.f32 -0.5, %v288_v28  ;;  %v299_v49 = vmul.f32 %v295_v37, %v287_v27  ;;  %v300_v50 = vmul.f32 %v296_v38, %v288_v28  ;;  %v423_v52 = vadd.f32 -0.5, %v289_v30  ;;  %v199_v58 = vld [vmem:[#allocation15 + $0x38] sm:$0xff]  ;;  %v200_v59 = vld [vmem:[#allocation15 + $0x40] sm:$0xff] }
  0x88   :  { %v301_v51 = vmul.f32 %v297_v39, %v289_v30  ;;  %v306_v56 = vsel %vm290_vm0, %v298_v42, %v420_v43  ;;  %v203_v61 = vsub.f32 %v193_v40, %v185_v32  ;;  %v204_v62 = vsub.f32 %v194_v41, %v186_v33  ;;  %v278_v63 = vld [vmem:[#allocation18 + $0x10] sm:$0xff]  ;;  %v281_v0 = vld [vmem:[#allocation18 + $0x28] sm:$0xff] }
  0x89   :  { %339 = vadd.xlane.f32.xlu0 %v176_v29  ;;  %v307_v1 = vsel %vm291_vm1, %v299_v49, %v421_v44  ;;  %v308_v2 = vsel %vm292_vm2, %v300_v50, %v422_v45  ;;  %v205_v4 = vsub.f32 %v195_v48, %v187_v35  ;;  %v206_v9 = vsub.f32 %v197_v54, %v188_v46 }
  0x8a   :  { %v309_v3 = vsel %vm293_vm3, %v301_v51, %v423_v52  ;;  %v310_v5 = vadd.f32 %v307_v1, %v306_v56  ;;  %v207_v10 = vsub.f32 %v198_v55, %v189_v47  ;;  %v208_v11 = vsub.f32 %v199_v58, %v190_v53 }
  0x8b   :  { %v311_v8 = vadd.f32 %v309_v3, %v308_v2  ;;  %v209_v12 = vsub.f32 %v200_v59, %v191_v57  ;;  %v210_v13 = vand.u32 2147483647, %v202_v60  ;;  %v211_v16 = vand.u32 2147483647, %v203_v61 }
  0x8c   :  { %v312_v14 = vmul.f32 %v310_v5, %v278_v63  ;;  %v212_v17 = vand.u32 2147483647, %v204_v62  ;;  %v213_v18 = vand.u32 2147483647, %v205_v4  ;;  %v214_v19 = vand.u32 2147483647, %v206_v9 }
  0x8d   :  { %v313_v15 = vmul.f32 %v311_v8, %v281_v0  ;;  %v215_v20 = vand.u32 2147483647, %v207_v10  ;;  %v216_v23 = vand.u32 2147483647, %v208_v11  ;;  %v217_v24 = vand.u32 2147483647, %v209_v12 }
  0x8e   :  { %v314_v21 = vmul.f32 %v312_v14, %v806_v6  ;;  %vm218_vm4 = vcmp.lt.f32.partialorder %v210_v13, 1.0  ;;  %vm219_vm5 = vcmp.lt.f32.partialorder %v211_v16, 1.0  ;;  %vm220_vm6 = vcmp.lt.f32.partialorder %v212_v17, 1.0  ;;  %v196_v62 = vld [vmem:[#allocation15 + $0x20] sm:$0xff]  ;;  %v201_v63 = vld [vmem:[#allocation15 + $0x48] sm:$0xff] }
  0x8f   :  { %v315_v22 = vmul.f32 %v313_v15, %v808_v7  ;;  %vm222_vm7 = vcmp.lt.f32.partialorder %v214_v19, 1.0  ;;  %vm223_vm8 = vcmp.lt.f32.partialorder %v215_v20, 1.0  ;;  %vm224_vm9 = vcmp.lt.f32.partialorder %v216_v23, 1.0 }
  0x90   :  { %v226_v26 = vmul.f32 0.5, %v210_v13  ;;  %v227_v27 = vmul.f32 0.5, %v211_v16  ;;  %v228_v28 = vmul.f32 0.5, %v212_v17  ;;  %v229_v29 = vmul.f32 0.5, %v213_v18 }
  0x91   :  { %v316_v25 = vadd.f32 %v315_v22, %v314_v21  ;;  %v230_v30 = vmul.f32 0.5, %v214_v19  ;;  %v231_v31 = vmul.f32 0.5, %v215_v20  ;;  %v232_v32 = vmul.f32 0.5, %v216_v23 }
  0x92   :  { %v233_v33 = vmul.f32 0.5, %v217_v24  ;;  %v234_v34 = vmul.f32 %v226_v26, %v210_v13  ;;  %v235_v35 = vmul.f32 %v227_v27, %v211_v16  ;;  %v236_v36 = vmul.f32 %v228_v28, %v212_v17 }
  0x93   :  { %381 = vadd.xlane.f32.xlu0 %v316_v25  ;;  %v237_v37 = vmul.f32 %v229_v29, %v213_v18  ;;  %v238_v38 = vmul.f32 %v230_v30, %v214_v19  ;;  %v239_v39 = vmul.f32 %v231_v31, %v215_v20  ;;  %v240_v40 = vmul.f32 %v232_v32, %v216_v23 }
  0x94   :  { %v241_v41 = vmul.f32 %v233_v33, %v217_v24  ;;  %v412_v42 = vadd.f32 -0.5, %v210_v13  ;;  %v413_v43 = vadd.f32 -0.5, %v211_v16  ;;  %v414_v44 = vadd.f32 -0.5, %v212_v17 }
  0x95   :  { %v415_v45 = vadd.f32 -0.5, %v213_v18  ;;  %v416_v46 = vadd.f32 -0.5, %v214_v19  ;;  %v417_v47 = vadd.f32 -0.5, %v215_v20  ;;  %v418_v48 = vadd.f32 -0.5, %v216_v23 }
  0x96   :  { %v419_v49 = vadd.f32 -0.5, %v217_v24  ;;  %vm221_vm10 = vcmp.lt.f32.partialorder %v213_v18, 1.0  ;;  %vm225_vm11 = vcmp.lt.f32.partialorder %v217_v24, 1.0  ;;  %v250_v50 = vsel %vm218_vm4, %v234_v34, %v412_v42 }
  0x97   :  { %v251_v51 = vsel %vm219_vm5, %v235_v35, %v413_v43  ;;  %v252_v52 = vsel %vm220_vm6, %v236_v36, %v414_v44  ;;  %v254_v53 = vsel %vm222_vm7, %v238_v38, %v416_v46  ;;  %v255_v54 = vsel %vm223_vm8, %v239_v39, %v417_v47 }
  0x98   :  { %v256_v55 = vsel %vm224_vm9, %v240_v40, %v418_v48  ;;  %v258_v56 = vadd.f32 %v251_v51, %v250_v50  ;;  %v261_v57 = vadd.f32 %v255_v54, %v254_v53  ;;  %v253_v58 = vsel %vm221_vm10, %v237_v37, %v415_v45 }
  0x99   :  { %v257_v59 = vsel %vm225_vm11, %v241_v41, %v419_v49  ;;  %v322_v42 = vlaneseq }
  0x9a   :  { %v259_v60 = vadd.f32 %v258_v56, %v252_v52  ;;  %v262_v61 = vadd.f32 %v261_v57, %v256_v55 }
  0x9b   :  { %v323_v43 = vand.u32 127, %v322_v42 }
  0x9c   :  { %v260_v0 = vadd.f32 %v259_v60, %v253_v58  ;;  %v263_v1 = vadd.f32 %v262_v61, %v257_v59 }
  0x9d   :  { %vm337_vm12 = vcmp.eq.s32.totalorder %v323_v43, 1  ;;  %vm324_vm13 = vcmp.eq.s32.totalorder %v323_v43, 0  ;;  %vm351_vm14 = vcmp.eq.s32.totalorder %v323_v43, 2  ;;  %vm365_vm15 = vcmp.eq.s32.totalorder %v323_v43, 3 }
  0x9e   :  { %v264_v2 = vmul.f32 %v260_v0, %v196_v62  ;;  %v265_v3 = vmul.f32 %v263_v1, %v201_v63  ;;  %vm379_vm0 = vcmp.eq.s32.totalorder %v323_v43, 4 }
  0xa0   :  { %v266_v4 = vmul.f32 %v264_v2, %v806_v6  ;;  %v267_v5 = vmul.f32 %v265_v3, %v808_v7 }
  0xa2   :  { %v268_v8 = vadd.f32 %v267_v5, %v266_v4 }
  0xa4   :  { %367 = vadd.xlane.f32.xlu1 %v268_v8 }
 0x110   :  { %v354_v9 = vpop.xlane.xlu1 %353 }
 0x111   :  { %v355_v10 = vrot.slane %v354_v9, 4 }
 0x112   :  { %v327_v11 = vpop.xlane.xlu0 %326 }
 0x113   :  { %v328_v12 = vrot.slane %v327_v11, 4  ;;  %v356_v13 = vadd.f32 %v355_v10, %v354_v9 }
 0x115   :  { %v329_v14 = vadd.f32 %v328_v12, %v327_v11  ;;  %v357_v15 = vrot.slane %v356_v13, 2 }
 0x116   :  { %v340_v16 = vpop.xlane.xlu0 %339 }
 0x117   :  { %v330_v17 = vrot.slane %v329_v14, 2  ;;  %v341_v18 = vrot.slane %v340_v16, 4  ;;  %v358_v19 = vadd.f32 %v357_v15, %v356_v13 }
 0x119   :  { %v342_v20 = vadd.f32 %v341_v18, %v340_v16  ;;  %v331_v21 = vadd.f32 %v330_v17, %v329_v14  ;;  %v359_v6 = vrot.slane %v358_v19, 1 }
 0x11b   :  { %v343_v22 = vrot.slane %v342_v20, 2  ;;  %v332_v23 = vrot.slane %v331_v21, 1  ;;  %v360_v26 = vadd.f32 %v359_v6, %v358_v19 }
 0x11d   :  { %v333_v24 = vadd.f32 %v332_v23, %v331_v21  ;;  %v344_v7 = vadd.f32 %v343_v22, %v342_v20 }
 0x11f   :  { %424 = vpush %v333_v24  ;;  %v345_v25 = vrot.slane %v344_v7, 1 }
 0x120   :  { %v382_v28 = vpop.xlane.xlu0 %381 }
 0x121   :  { %v346_v27 = vadd.f32 %v345_v25, %v344_v7  ;;  %v383_v29 = vrot.slane %v382_v28, 4 }
 0x123   :  { %426 = vpush %v346_v27  ;;  %v384_v30 = vadd.f32 %v383_v29, %v382_v28 }
 0x124   :  { %428 = vpush %v360_v26 }
 0x125   :  { %v385_v31 = vrot.slane %v384_v30, 2 }
 0x127   :  { %v386_v35 = vadd.f32 %v385_v31, %v384_v30 }
 0x129   :  { %v387_v38 = vrot.slane %v386_v35, 1 }
 0x12b   :  { %v388_v41 = vadd.f32 %v387_v38, %v386_v35 }
 0x131   :  { %v368_v32 = vpop.xlane.xlu1 %367 }
 0x132   :  { %v369_v33 = vrot.slane %v368_v32, 4 }
 0x134   :  { %v370_v34 = vadd.f32 %v369_v33, %v368_v32 }
 0x136   :  { %v371_v36 = vrot.slane %v370_v34, 2 }
 0x138   :  { %v372_v37 = vadd.f32 %v371_v36, %v370_v34 }
 0x13a   :  { %v373_v39 = vrot.slane %v372_v37, 1 }
 0x13c   :  { %v374_v40 = vadd.f32 %v373_v39, %v372_v37 }
 0x13e   :  { %430 = vpush %v374_v40 }
 0x13f   :  { %432 = vpush %v388_v41 }
 0x150   :  { %s425_s6 = spop %424 }
 0x151   :  { %v335_v45 = vstv %s425_s6 }
 0x152   :  { %v336_v48 = vsel %vm324_vm13, %v335_v45, 0.0 }
 0x154   :  { %s427_s13 = spop %426 }
 0x155   :  { %v348_v44 = vstv %s427_s13  ;;  %s429_s14 = spop %428 }
 0x156   :  { %v349_v46 = vsel %vm337_vm12, %v348_v44, 0.0  ;;  %v362_v47 = vstv %s429_s14 }
 0x157   :  { %v350_v49 = vadd.f32 %v349_v46, %v336_v48  ;;  %v363_v50 = vsel %vm351_vm14, %v362_v47, 0.0 }
 0x159   :  { %v364_v51 = vadd.f32 %v363_v50, %v350_v49 }
 0x16f   :  { %s431_s16 = spop %430 }
 0x170   :  { %v376_v52 = vstv %s431_s16  ;;  %s433_s3 = spop %432 }
 0x171   :  { %v377_v53 = vsel %vm365_vm15, %v376_v52, 0.0  ;;  %v390_v54 = vstv %s433_s3 }
 0x172   :  { %v378_v55 = vadd.f32 %v377_v53, %v364_v51  ;;  %v391_v56 = vsel %vm379_vm0, %v390_v54, 0.0 }
 0x174   :  { %v392_v57 = vadd.f32 %v391_v56, %v378_v55 }
 0x176   :  { %393 = vst [vmem:[#allocation19] sm:$0xff] %v392_v57 }
 0x177   :  { %609 = shalt.err (!%p606_p4)
}
 0x178   :  { %s610_s19 = scalar_lea.hbm %s847_s7, 128 }
 0x179   :  { %p611_p5 = scmp.ne.s32.totalorder %s847_s7, %s610_s19  ;;  %p614_p6 = scmp.lt.u32.totalorder %s610_s19, %s847_s7 }
 0x17b   :  { %p616_p7 = pnand %p614_p6, %p611_p5 }
 0x17d   :  { %619 = shalt.err (!%p616_p7)
}
 0x17e   :  { %403 = dma.vmem_to_hbm [thread:$0]  %s401_s30, 128, %s847_s7, [#allocation9]  }
 0x17f   :  { %628 = dma.done.wait [#allocation9], 128  }
 0x180   :  { %629 = vsyncadd [#allocation9], 4294967168 }
 0x181   :  { %407 = vsyncpa [#allocation8], 1 }
 0x182   :  { %408 = vsyncpa [#allocation11], 1 }
 0x183   :  { %409 = vsyncpa [#allocation14], 1 }
 0x184   :  { %410 = vsyncpa [#allocation17], 1 }
 0x185   :  { %411 = vsyncpa [#allocation9], 1 }

</bundles_post_ra>
